<compile_context>
chip_gen: v5e
topology: v5e:2x2
jax: 0.10.0
libtpu: 0.0.40
codegen_flags: <defaults>
</compile_context>

<pallas_src>
import math
import functools

import jax
import jax.numpy as jnp
from jax import lax
from jax.experimental import pallas as pl
from jax.experimental.pallas import tpu as pltpu

NEG_INF = -1e30  # finite "minus infinity" (NaN-safe: exp underflows to 0)


def _vmem_limit_bytes() -> int:
    """~75% of physical VMEM per TC: ~96 MiB on v5e/v6e (128 MiB), ~48 MiB on v7x (64 MiB)."""
    try:
        cap = int(pltpu.get_tpu_info().vmem_capacity_bytes)
        return (cap * 3) // 4
    except Exception:
        return 64 * 1024 * 1024


def _pick_seq_tile(L: int) -> int:
    # 256 fills the v6e/v7x 256-wide MXU; 128 otherwise; tiny L -> whole sequence.
    for cand in (256, 128):
        if L % cand == 0:
            return cand
    return L


# --------------------------------------------------------------------------
# Kernel 1: fused QKV projection (1/sqrt(hd) scale folded into q).
# --------------------------------------------------------------------------
def _qkv_proj_kernel(x_ref, wqkv_ref, bqkv_ref, q_ref, k_ref, v_ref, *, scale):
    x = x_ref[0]                                                    # (T, D)
    D = x.shape[-1]
    qkv = jnp.dot(x, wqkv_ref[...], preferred_element_type=jnp.float32)
    qkv = qkv + bqkv_ref[0]                                         # (T, 3D)
    q_ref[0] = (qkv[:, 0 * D:1 * D] * scale).astype(q_ref.dtype)
    k_ref[0] = qkv[:, 1 * D:2 * D].astype(k_ref.dtype)
    v_ref[0] = qkv[:, 2 * D:3 * D].astype(v_ref.dtype)


# --------------------------------------------------------------------------
# Kernel 2: causal flash attention on a triangular grid + fused output proj.
# --------------------------------------------------------------------------
def _flash_attn_kernel(qi_tab_ref, ki_tab_ref,                       # scalar prefetch (SMEM)
                       q_ref, k_ref, v_ref, wo_ref, bo_ref,          # inputs
                       out_ref,                                      # output
                       m_scr, l_scr, acc_scr,                        # VMEM scratch
                       *, num_heads, head_dim):
    step = pl.program_id(1)
    qi = qi_tab_ref[step]
    ki = ki_tab_ref[step]
    H, hd = num_heads, head_dim
    T = q_ref.shape[1]

    @pl.when(ki == 0)
    def _init():
        m_scr[...] = jnp.full_like(m_scr, NEG_INF)
        l_scr[...] = jnp.zeros_like(l_scr)
        acc_scr[...] = jnp.zeros_like(acc_scr)

    # Global causal mask for this (qi, ki) tile pair.  Since the triangular grid
    # guarantees qi >= ki, off-diagonal tiles reduce to an all-true mask; the
    # diagonal tile (qi == ki) is lower-triangular.  Built once per step.
    row = lax.broadcasted_iota(jnp.int32, (T, T), 0)
    col = lax.broadcasted_iota(jnp.int32, (T, T), 1)
    mask = (qi - ki) * T + row >= col

    q = q_ref[0]                                                     # (T, D), pre-scaled
    k = k_ref[0]                                                     # (T, D)
    v = v_ref[0]                                                     # (T, D)

    # Single traced body; heads are contiguous lane slices of the (T, D) tiles.
    # TODO(synk): lax.fori_loop + pl.ds(h*hd, hd)/pl.multiple_of for large H
    #             when hd % 128 == 0 (bounds vreg live ranges).
    for h in range(H):
        sl = slice(h * hd, (h + 1) * hd)
        q_h, k_h, v_h = q[:, sl], k[:, sl], v[:, sl]                 # (T, hd)
        s = lax.dot_general(q_h, k_h, (((1,), (1,)), ((), ())),      # q_h @ k_h^T
                            preferred_element_type=jnp.float32)      # (T, T)
        s = jnp.where(mask, s, NEG_INF)
        m_prev = m_scr[h]                                            # (T, 1)
        m_new = jnp.maximum(m_prev, jnp.max(s, axis=-1, keepdims=True))
        alpha = jnp.exp(m_prev - m_new)                              # (T, 1)
        p = jnp.exp(s - m_new)                                       # (T, T) unnormalized
        l_scr[h] = alpha * l_scr[h] + jnp.sum(p, axis=-1, keepdims=True)
        acc_scr[:, sl] = alpha * acc_scr[:, sl] + jnp.dot(
            p.astype(v_h.dtype), v_h, preferred_element_type=jnp.float32)
        m_scr[h] = m_new

    @pl.when(ki == qi)   # last kv step for this query tile on the triangular grid
    def _finalize():
        # Deferred per-head normalization on (T, 1) (exact reciprocal: free accuracy).
        for h in range(H):
            sl = slice(h * hd, (h + 1) * hd)
            inv_l = pl.reciprocal(l_scr[h], approx=False)            # (T, 1)
            acc_scr[:, sl] = acc_scr[:, sl] * inv_l
        merged = acc_scr[...]                                        # (T, D) lane-dense
        y = jnp.dot(merged.astype(wo_ref.dtype), wo_ref[...],
                    preferred_element_type=jnp.float32) + bo_ref[0]
        out_ref[0] = y.astype(out_ref.dtype)


# --------------------------------------------------------------------------
# Wrapper
# --------------------------------------------------------------------------
def causal_attention(x, wqkv, bqkv, wo, bo, *, num_heads: int,
                     qkv_dtype=None, seq_tile=None):
    """x: (B, L, D). Returns (B, L, D). Eval-mode forward of CausalAttention.

    qkv_dtype: dtype of the q/k/v round-trip between the two kernels.  Pass
    jnp.bfloat16 (or bf16 x/weights) for peak MXU throughput; defaults to
    x.dtype so f32 callers keep full precision.
    """
    B, L, D = x.shape
    H = num_heads
    assert D % H == 0
    hd = D // H
    scale = 1.0 / math.sqrt(hd)

    if qkv_dtype is None:
        qkv_dtype = x.dtype
    T = seq_tile if seq_tile is not None else _pick_seq_tile(L)
    assert L % T == 0, "sequence length must be a multiple of the tile size"
    n_t = L // T

    vmem_limit = _vmem_limit_bytes()
    bqkv2 = bqkv.reshape(1, 3 * D)
    bo2 = bo.reshape(1, D)

    # ---- Kernel 1: QKV projection ----
    q, k, v = pl.pallas_call(
        functools.partial(_qkv_proj_kernel, scale=scale),
        out_shape=(jax.ShapeDtypeStruct((B, L, D), qkv_dtype),
                   jax.ShapeDtypeStruct((B, L, D), qkv_dtype),
                   jax.ShapeDtypeStruct((B, L, D), qkv_dtype)),
        grid_spec=pltpu.PrefetchScalarGridSpec(
            num_scalar_prefetch=0,
            grid=(B, n_t),
            in_specs=[
                pl.BlockSpec((1, T, D), lambda b, i: (b, i, 0)),     # x tile
                pl.BlockSpec((D, 3 * D), lambda b, i: (0, 0)),       # W_qkv (resident)
                pl.BlockSpec((1, 3 * D), lambda b, i: (0, 0)),       # b_qkv
            ],
            out_specs=(pl.BlockSpec((1, T, D), lambda b, i: (b, i, 0)),
                       pl.BlockSpec((1, T, D), lambda b, i: (b, i, 0)),
                       pl.BlockSpec((1, T, D), lambda b, i: (b, i, 0))),
        ),
        compiler_params=pltpu.CompilerParams(
            dimension_semantics=("parallel", "parallel"),
            vmem_limit_bytes=vmem_limit),
    )(x, wqkv, bqkv2)

    # ---- Triangular step tables: flat step -> (qi, ki) with ki <= qi ----
    qi_list, ki_list = [], []
    for qi in range(n_t):
        for ki in range(qi + 1):
            qi_list.append(qi)
            ki_list.append(ki)
    n_steps = len(qi_list)
    qi_tab = jnp.asarray(qi_list, dtype=jnp.int32)
    ki_tab = jnp.asarray(ki_list, dtype=jnp.int32)

    q_map = lambda b, s, qt, kt: (b, qt[s], 0)
    kv_map = lambda b, s, qt, kt: (b, kt[s], 0)
    w_map = lambda b, s, qt, kt: (0, 0)

    # ---- Kernel 2: flash attention + fused output projection ----
    out = pl.pallas_call(
        functools.partial(_flash_attn_kernel, num_heads=H, head_dim=hd),
        out_shape=jax.ShapeDtypeStruct((B, L, D), x.dtype),
        grid_spec=pltpu.PrefetchScalarGridSpec(
            num_scalar_prefetch=2,
            grid=(B, n_steps),
            in_specs=[
                pl.BlockSpec((1, T, D), q_map),                      # q (pre-scaled)
                pl.BlockSpec((1, T, D), kv_map),                     # k
                pl.BlockSpec((1, T, D), kv_map),                     # v
                pl.BlockSpec((D, D), w_map),                         # W_out (resident)
                pl.BlockSpec((1, D), w_map),                         # b_out
            ],
            out_specs=pl.BlockSpec((1, T, D), q_map),
            scratch_shapes=[
                pltpu.VMEM((H, T, 1), jnp.float32),                  # running max m
                pltpu.VMEM((H, T, 1), jnp.float32),                  # running sum l
                pltpu.VMEM((T, D), jnp.float32),                     # unnormalized context
            ],
        ),
        compiler_params=pltpu.CompilerParams(
            dimension_semantics=("parallel", "arbitrary"),
            vmem_limit_bytes=vmem_limit),
    )(qi_tab, ki_tab, q, k, v, wo, bo2)
    return out


# --------------------------------------------------------------------------
# Pure-JAX reference mirroring the PyTorch forward (eval mode).
# --------------------------------------------------------------------------
def reference_causal_attention(x, wqkv, bqkv, wo, bo, *, num_heads: int):
    B, L, D = x.shape
    H = num_heads
    hd = D // H
    qkv = x @ wqkv + bqkv                                  # (B, L, 3D)
    q, k, v = jnp.split(qkv, 3, axis=2)
    q = q.reshape(B, L, H, hd).transpose(0, 2, 1, 3)
    k = k.reshape(B, L, H, hd).transpose(0, 2, 1, 3)
    v = v.reshape(B, L, H, hd).transpose(0, 2, 1, 3)
    scores = (q @ jnp.swapaxes(k, -2, -1)) / math.sqrt(hd)
    mask = jnp.tril(jnp.ones((L, L), dtype=bool))
    scores = jnp.where(mask[None, None], scores, -jnp.inf)
    probs = jax.nn.softmax(scores, axis=-1)
    outs = (probs @ v).transpose(0, 2, 1, 3).reshape(B, L, D)
    return outs @ wo + bo


if __name__ == "__main__":
    # Small, module-consistent shapes.
    B, L = 2, 8
    hidden_dim = 32
    num_heads = 4

    key = jax.random.PRNGKey(0)
    kx, k1, k2, k3, k4 = jax.random.split(key, 5)

    bound = 1.0 / math.sqrt(hidden_dim)
    wqkv = jax.random.uniform(k1, (hidden_dim, 3 * hidden_dim),
                              minval=-bound, maxval=bound, dtype=jnp.float32)
    bqkv = jax.random.uniform(k2, (3 * hidden_dim,),
                              minval=-bound, maxval=bound, dtype=jnp.float32)
    wo = jax.random.uniform(k3, (hidden_dim, hidden_dim),
                            minval=-bound, maxval=bound, dtype=jnp.float32)
    bo = jax.random.uniform(k4, (hidden_dim,),
                            minval=-bound, maxval=bound, dtype=jnp.float32)

    x = jax.random.normal(kx, (B, L, hidden_dim), dtype=jnp.float32)

    ref = reference_causal_attention(x, wqkv, bqkv, wo, bo, num_heads=num_heads)

    # f32 q/k/v path (exact reciprocal -> tight tolerance).
    out = causal_attention(x, wqkv, bqkv, wo, bo, num_heads=num_heads)
    out = jax.block_until_ready(out)
    assert out.shape == (B, L, hidden_dim)
    assert jnp.allclose(out, ref, atol=2e-3, rtol=2e-3), \
        f"f32 path max abs diff {jnp.max(jnp.abs(out - ref))}"

    # bf16 q/k/v round-trip path (MXU-rate / halved HBM traffic; looser tolerance).
    out_bf16 = causal_attention(x, wqkv, bqkv, wo, bo, num_heads=num_heads,
                                qkv_dtype=jnp.bfloat16)
    out_bf16 = jax.block_until_ready(out_bf16)
    assert jnp.allclose(out_bf16, ref, atol=5e-2, rtol=5e-2), \
        f"bf16 path max abs diff {jnp.max(jnp.abs(out_bf16 - ref))}"

    print("KERNEL_OK")
</pallas_src>

<mosaic_0001>
module attributes {stable_mosaic.version = 11 : i64} {
  func.func @_qkv_proj_kernel(%arg0: i32, %arg1: i32, %arg2: memref<1x8x32xf32, #tpu.memory_space<vmem>>, %arg3: memref<32x96xf32, #tpu.memory_space<vmem>>, %arg4: memref<1x96xf32, #tpu.memory_space<vmem>>, %arg5: memref<1x8x32xf32, #tpu.memory_space<vmem>>, %arg6: memref<1x8x32xf32, #tpu.memory_space<vmem>>, %arg7: memref<1x8x32xf32, #tpu.memory_space<vmem>>) attributes {dimension_semantics = [#tpu.dimension_semantics<parallel>, #tpu.dimension_semantics<parallel>], iteration_bounds = array<i64: 2, 1>, scalar_prefetch = 0 : i64, scratch_operands = 0 : i64, tpu.core_type = #tpu.core_type<tc>, window_params = [{transform_indices = @transform_0, window_bounds = array<i64: 1, 8, 32>}, {pipeline_mode = #tpu.pipeline_mode<synchronous>, transform_indices = @transform_1, window_bounds = array<i64: 32, 96>}, {pipeline_mode = #tpu.pipeline_mode<synchronous>, transform_indices = @transform_2, window_bounds = array<i64: 1, 96>}, {transform_indices = @transform_3, window_bounds = array<i64: 1, 8, 32>}, {transform_indices = @transform_4, window_bounds = array<i64: 1, 8, 32>}, {transform_indices = @transform_5, window_bounds = array<i64: 1, 8, 32>}]} {
    %c0 = arith.constant 0 : index
    %c0_0 = arith.constant 0 : index
    %c0_1 = arith.constant 0 : index
    %0 = vector.load %arg2[%c0, %c0_0, %c0_1] : memref<1x8x32xf32, #tpu.memory_space<vmem>>, vector<1x8x32xf32>
    %1 = vector.shape_cast %0 : vector<1x8x32xf32> to vector<8x32xf32>
    %c0_2 = arith.constant 0 : index
    %c0_3 = arith.constant 0 : index
    %2 = vector.load %arg3[%c0_2, %c0_3] : memref<32x96xf32, #tpu.memory_space<vmem>>, vector<32x96xf32>
    %cst = arith.constant dense<0.000000e+00> : vector<8x96xf32>
    %3 = tpu.matmul %1, %2, %cst {dimension_numbers = #tpu.dot_dimension_numbers<[1], [0], [0], [1], [0, 0, 1, 1], [], []>} : vector<8x32xf32>, vector<32x96xf32>, vector<8x96xf32> -> vector<8x96xf32>
    %c0_4 = arith.constant 0 : index
    %c0_5 = arith.constant 0 : index
    %4 = vector.load %arg4[%c0_4, %c0_5] : memref<1x96xf32, #tpu.memory_space<vmem>>, vector<1x96xf32>
    %5 = vector.shape_cast %4 : vector<1x96xf32> to vector<96xf32>
    %6 = vector.shape_cast %5 : vector<96xf32> to vector<1x96xf32>
    %7 = vector.broadcast %6 : vector<1x96xf32> to vector<8x96xf32>
    %8 = arith.addf %3, %7 : vector<8x96xf32>
    %9 = vector.extract_strided_slice %8 {offsets = [0, 0], sizes = [8, 32], strides = [1, 1]} : vector<8x96xf32> to vector<8x32xf32>
    %cst_6 = arith.constant 0.353553385 : f32
    %10 = vector.broadcast %cst_6 : f32 to vector<8x32xf32>
    %11 = arith.mulf %9, %10 : vector<8x32xf32>
    %c0_7 = arith.constant 0 : index
    %c0_8 = arith.constant 0 : index
    %c0_9 = arith.constant 0 : index
    %12 = vector.load %arg5[%c0_7, %c0_8, %c0_9] : memref<1x8x32xf32, #tpu.memory_space<vmem>>, vector<1x8x32xf32>
    %13 = vector.shape_cast %12 : vector<1x8x32xf32> to vector<8x32xf32>
    %14 = vector.shape_cast %11 : vector<8x32xf32> to vector<1x8x32xf32>
    tpu.vector_store %arg5[%c0_7, %c0_8, %c0_9], %14 {strides = array<i32>} : memref<1x8x32xf32, #tpu.memory_space<vmem>>, vector<1x8x32xf32>,
    %15 = vector.extract_strided_slice %8 {offsets = [0, 32], sizes = [8, 32], strides = [1, 1]} : vector<8x96xf32> to vector<8x32xf32>
    %c0_10 = arith.constant 0 : index
    %c0_11 = arith.constant 0 : index
    %c0_12 = arith.constant 0 : index
    %16 = vector.load %arg6[%c0_10, %c0_11, %c0_12] : memref<1x8x32xf32, #tpu.memory_space<vmem>>, vector<1x8x32xf32>
    %17 = vector.shape_cast %16 : vector<1x8x32xf32> to vector<8x32xf32>
    %18 = vector.shape_cast %15 : vector<8x32xf32> to vector<1x8x32xf32>
    tpu.vector_store %arg6[%c0_10, %c0_11, %c0_12], %18 {strides = array<i32>} : memref<1x8x32xf32, #tpu.memory_space<vmem>>, vector<1x8x32xf32>,
    %19 = vector.extract_strided_slice %8 {offsets = [0, 64], sizes = [8, 32], strides = [1, 1]} : vector<8x96xf32> to vector<8x32xf32>
    %c0_13 = arith.constant 0 : index
    %c0_14 = arith.constant 0 : index
    %c0_15 = arith.constant 0 : index
    %20 = vector.load %arg7[%c0_13, %c0_14, %c0_15] : memref<1x8x32xf32, #tpu.memory_space<vmem>>, vector<1x8x32xf32>
    %21 = vector.shape_cast %20 : vector<1x8x32xf32> to vector<8x32xf32>
    %22 = vector.shape_cast %19 : vector<8x32xf32> to vector<1x8x32xf32>
    tpu.vector_store %arg7[%c0_13, %c0_14, %c0_15], %22 {strides = array<i32>} : memref<1x8x32xf32, #tpu.memory_space<vmem>>, vector<1x8x32xf32>,
    return
  }
  func.func @transform_0(%arg0: i32, %arg1: i32) -> (i32, i32, i32) {
    %c0_i32 = arith.constant 0 : i32
    %c0_i32_0 = arith.constant 0 : i32
    return %arg0, %arg1, %c0_i32 : i32, i32, i32
  }
  func.func @transform_1(%arg0: i32, %arg1: i32) -> (i32, i32) {
    %c0_i32 = arith.constant 0 : i32
    %c0_i32_0 = arith.constant 0 : i32
    %c0_i32_1 = arith.constant 0 : i32
    return %c0_i32, %c0_i32_0 : i32, i32
  }
  func.func @transform_2(%arg0: i32, %arg1: i32) -> (i32, i32) {
    %c0_i32 = arith.constant 0 : i32
    %c0_i32_0 = arith.constant 0 : i32
    %c0_i32_1 = arith.constant 0 : i32
    return %c0_i32, %c0_i32_0 : i32, i32
  }
  func.func @transform_3(%arg0: i32, %arg1: i32) -> (i32, i32, i32) {
    %c0_i32 = arith.constant 0 : i32
    %c0_i32_0 = arith.constant 0 : i32
    return %arg0, %arg1, %c0_i32 : i32, i32, i32
  }
  func.func @transform_4(%arg0: i32, %arg1: i32) -> (i32, i32, i32) {
    %c0_i32 = arith.constant 0 : i32
    %c0_i32_0 = arith.constant 0 : i32
    return %arg0, %arg1, %c0_i32 : i32, i32, i32
  }
  func.func @transform_5(%arg0: i32, %arg1: i32) -> (i32, i32, i32) {
    %c0_i32 = arith.constant 0 : i32
    %c0_i32_0 = arith.constant 0 : i32
    return %arg0, %arg1, %c0_i32 : i32, i32, i32
  }
}

</mosaic_0001>

<bundles_post_ra>
// kernel: tpu_custom_call.1
= control target key start
LH: loop header
LB: loop body
LE: loop exit
PB: predicated region body
PF: predicated region fallthrough
CT: control target
= control target key end

     0   :  { %s1103_s0 = inlined_call_operand.hbm [shape: f32[2,8,32], index: 0, kind: input, shape index: {}]   ;;  %s1104_s1 = inlined_call_operand.hbm [shape: f32[32,96], index: 1, kind: input, shape index: {}]   ;;  %s1105_s2 = inlined_call_operand.vmem [shape: f32[1,96], index: 2, kind: input, shape index: {}]   ;;  %s1106_s3 = inlined_call_operand.hbm [shape: f32[2,8,32], index: 3, kind: output, shape index: {0}]   ;;  %s1107_s4 = inlined_call_operand.hbm [shape: f32[2,8,32], index: 4, kind: output, shape index: {1}]   ;;  %s1108_s5 = inlined_call_operand.hbm [shape: f32[2,8,32], index: 5, kind: output, shape index: {2}]  }
   0x1   :  { %1110 = sst [smem:[#allocation15_spill]] %s1103_s0 }
   0x2   :  { %11 = vsyncpa [#allocation3], 0 }
   0x3   :  { %13 = vsyncpa [#allocation3 + $0x1], 0 }
   0x4   :  { %14 = vsyncpa [#allocation6], 0 }
   0x5   :  { %15 = vsyncpa [#allocation4], 0 }
   0x6   :  { %17 = vsyncpa [#allocation4 + $0x1], 0 }
   0x7   :  { %18 = vsyncpa [#allocation9], 0 }
   0x8   :  { %20 = vsyncpa [#allocation9 + $0x1], 0  ;;  %s907_s18 = smov 0   ;;  %s909_s19 = smov 0  }
   0x9   :  { %s911_s20 = smov 0   ;;  %s913_s21 = smov 0  }
   0xa   :  { %s915_s22 = smov 0   ;;  %s917_s23 = smov 0  }
   0xb LB: > { %s938_s24 = sadd.s32 4294967295, %s870_s23   ;;  %p556_p0 = scmp.ge.s32.totalorder %s870_s23, 1  ;;  %s870_s23 = sphi %s917_s23, %s26_s23   ;;  %s866_s22 = sphi %s915_s22, %s1122_s22   ;;  %s862_s21 = sphi %s913_s21, %s1121_s21   ;;  %s858_s20 = sphi %s911_s20, %s1120_s20   ;;  %s854_s19 = sphi %s909_s19, %s1119_s19   ;;  %s850_s18 = sphi %s907_s18, %s1118_s18  }
   0xc   : > { %p61_p1 = scmp.eq.s32.totalorder %s938_s24, 0  ;;  %p197_p2 = scmp.lt.s32.totalorder %s870_s23, 3 }
   0xd   : > { %s208_s27 = sshll.u32 %s1104_s1, 4  ;;  %s872_s29 = smov [#allocation5]   ;;  %s209_s27 = int_to_ptr.hbm [resolvable:$true] %s208_s27 }
   0xe   : > { %p946_p3 = pnand %p556_p0, %p197_p2  ;;  %s210_s30 = sshll.u32 %s872_s29, 4  ;;  %s211_s30 = int_to_ptr.vmem [resolvable:$true] %s210_s30 }
   0xf   : > { %p558_p6 = scmp.ge.s32.totalorder %s870_s23, 2  ;;  %s873_s6 = smov 128  }
  0x10   : > { %p588_p4 = pneg %p946_p3  ;;  %s874_s7 = smov 8  }
  0x11   : > { %s1109_s8 = sadd.s32 4294967294, %s870_s23   ;;  %s38_s9 = sadd.s32 1, %s866_s22 }
  0x12   : > { %p589_p5 = pnand %p588_p4, %p61_p1  ;;  %s47_s10 = sadd.s32 1, %s858_s20 }
  0x13   : > { %p40_p7 = scmp.ge.s32.totalorder %s38_s9, 2  ;;  %p54_p8 = scmp.ne.s32.totalorder %s858_s20, %s854_s19 }
  0x14   : > { %591 = dma.hbm_to_vmem [thread:$0]  (!%p589_p5), %s209_s27, 512, %s211_s30, [#allocation6], %s873_s6, %s873_s6, %s874_s7  }
  0x15   : > { %p55_p9 = scmp.eq.s32.totalorder %s870_s23, 0  ;;  %p60_p10 = scmp.ne.s32.totalorder %s854_s19, %s850_s18 }
  0x16   : > { %s1124_s9 = smov (%p40_p7, %s38_s9), 0  ;;  %p128_p13 = scmp.eq.s32.totalorder %s938_s24, 1 }
  0x17   : > { %p965_p11 = por %p55_p9, %p54_p8  ;;  %p971_p12 = por %p61_p1, %p60_p10 }
  0x18   : > { %s42_s13 = ssub.s32 %s866_s22, %s1124_s9  ;;  %p134_p2 = scmp.eq.s32.totalorder %s1109_s8, 1 }
  0x19   : > { %p45_p0 = scmp.eq.s32.totalorder %s42_s13, 0  ;;  %p980_p4 = por %p128_p13, %p54_p8 }
  0x1a   : > { %p607_p5 = scmp.lt.s32.totalorder %s870_s23, 2  ;;  %p988_p7 = por %p134_p2, %p60_p10 }
  0x1b   : > { %s986_s15 = scalar_select %p45_p0, %s858_s20, %s47_s10  }
  0x1c   : > { %s227_s17 = sand.u32 1, %s858_s20   ;;  %s560_s26 = sshll.u32 %s866_s22, 3 }
  0x1d   : > { %s559_s25 = sshll.u32 %s227_s17, 3  ;;  %s1116_s0 = sld [smem:[#allocation15_spill]] }
  0x1e   : > { %s231_s6 = scalar_lea.vmem [#allocation2], %s559_s25  ;;  %p593_p8 = pnand %p607_p5, %p965_p11 }
  0x1f   : > { %s240_s7 = sshll.u32 %s231_s6, 4  ;;  %s228_s10 = scalar_lea.sflag [#allocation3], %s227_s17  ;;  %s241_s7 = int_to_ptr.vmem [resolvable:$true] %s240_s7 }
  0x20   : > { %s1002_s8 = sand.u32 (!%p946_p3), 1, %s854_s19  }
  0x21   : > { %249 = sbr.rel (%p946_p3) target bundleno = 308 (0x134), region = 32  ;;  %s1005_s27 = sshll.u32 (!%p946_p3), %s1002_s8, 3 }
  0x22   : > { %s252_s25 = scalar_lea.sflag (!%p946_p3), [#allocation3], %s1002_s8 }
  0x23   : > { %s236_s30 = scalar_lea.hbm %s1116_s0, %s560_s26  ;;  %s255_s26 = scalar_lea.vmem (!%p946_p3), [#allocation2], %s1005_s27 }
  0x24   : > { %s238_s13 = sshll.u32 %s236_s30, 4  ;;  %s239_s13 = int_to_ptr.hbm [resolvable:$true] %s238_s13 }
  0x25   : > { %595 = dma.hbm_to_vmem [thread:$0]  (!%p593_p8), %s239_s13, 128, %s241_s7, %s228_s10  }
  0x26   : > { %833 = dma.done.wait (%p971_p12), %s252_s25, 128  }
  0x27   : > { %835 = vsyncadd (%p971_p12), %s252_s25, 4294967168 }
  0x28   : > { %837 = dma.done.wait (%p61_p1), [#allocation6], 512  }
  0x29   : > { %839 = vsyncadd (%p61_p1), [#allocation6], 4294966784  ;;  %v302_v0 = vld [vmem:[#allocation5 + $0x18] sm:$0xff]  ;;  %v301_v1 = vld [vmem:[#allocation5 + $0x10] sm:$0xff]  ;;  %vm307_vm0 = vcmask 261120   ;;  %s1019_s28 = sshll.u32 %s862_s21, 3 }
  0x2a   : > { %323 = vmatpush.msra.mxu0 %v302_v0  ;;  %v300_v2 = vld [vmem:[#allocation5 + $0x8] sm:$0xff]  ;;  %v299_v3 = vld [vmem:[#allocation5] sm:$0xff]  ;;  %v298_v4 = vld [vmem:[%s255_s26] sm:$0xff]  ;;  %s364_s30 = scalar_lea.hbm %s1106_s3, %s1019_s28  ;;  %s283_s6 = scalar_lea.vmem [#allocation7], %s1005_s27 }
  0x2b   : > { %v663_v5 = vld [vmem:[%s1105_s2] ss:$0 sm:$0xff]  ;;  %s366_s7 = sshll.u32 %s283_s6, 4  ;;  %s368_s13 = sshll.u32 %s364_s30, 4  ;;  %s367_s7 = int_to_ptr.vmem [resolvable:$true] %s366_s7  ;;  %s369_s13 = int_to_ptr.hbm [resolvable:$true] %s368_s13 }
  0x2c   : > { %324 = vmatpush.msra.mxu0 %v301_v1  ;;  %s875_s10 = smov 96   ;;  %s343_s21 = scalar_lea.sflag [#allocation4], %s1002_s8 }
  0x2d   : > { %s738_s25 = sshra.s32 %s369_s13, 4  ;;  %s744_s17 = scalar_lea.hbm %s1106_s3, 16  ;;  %s739_s25 = int_to_ptr.hbm [resolvable:$true] %s738_s25 }
  0x2e   : > { %325 = vmatpush.msra.mxu0 %v300_v2  ;;  %s740_s26 = scalar_lea.hbm %s739_s25, 8  ;;  %p745_p10 = scmp.lt.s32.totalorder %s739_s25, %s1106_s3 }
  0x2f   : > { %p741_p1 = scmp.ne.s32.totalorder %s739_s25, %s740_s26  ;;  %p746_p11 = scmp.lt.s32.totalorder %s744_s17, %s740_s26 }
  0x30   : > { %326 = vmatpush.msra.mxu0 %v299_v3 }
  0x31   : > { %567 = vmatmul.msk.f32.vlgmr.msra.gmra.mxu0 %vm307_vm0, %v298_v4  ;;  %p742_p3 = pnand %p741_p1, %p980_p4  ;;  %p747_p12 = por %p746_p11, %p745_p10 }
  0x33   : > { %p743_p9 = pneg %p742_p3 }
  0x35   : > { %p748_p13 = pnand %p747_p12, %p743_p9 }
  0xae   : > { %v328_v6 = vpop.f32.mrf.mxu0 }
  0xaf   : > { %v329_v7 = vadd.f32 %v663_v5, %v328_v6 }
  0xb1   : > { %v331_v8 = vmul.f32 0.35355338, %v329_v7  ;;  %334 = vrot.lane.b32.xlu0 %v329_v7, %s875_s10 }
  0xb3   : > { %332 = vst.msk [vmem:[%s283_s6] sm:$0xff] %vm307_vm0, %v331_v8 }
  0xb4   : > { %751 = shalt.err (!%p748_p13)
}
  0xb5   : > { %582 = dma.vmem_to_hbm [thread:$0]  (%p980_p4), %s367_s7, 128, %s369_s13, %s343_s21  }
  0xb6   : > { %s876_s8 = smov 64   ;;  %s379_s11 = scalar_lea.hbm %s1107_s4, %s1019_s28 }
  0xb7   : > { %s347_s12 = sand.u32 1, %s938_s24   ;;  %s290_s25 = scalar_lea.vmem [#allocation8], %s1005_s27 }
  0xb8   : > { %s381_s26 = sshll.u32 %s290_s25, 4  ;;  %s383_s17 = sshll.u32 %s379_s11, 4  ;;  %s382_s26 = int_to_ptr.vmem [resolvable:$true] %s381_s26  ;;  %s384_s17 = int_to_ptr.hbm [resolvable:$true] %s383_s17 }
  0xb9   : > { %338 = vrot.lane.b32.xlu0 %v329_v7, %s876_s8  ;;  %s394_s7 = scalar_lea.hbm %s1108_s5, %s1019_s28  ;;  %s1052_s13 = scalar_lea.sflag [#allocation9], %s347_s12 }
  0xba   : > { %s766_s21 = sshra.s32 %s384_s17, 4  ;;  %s772_s10 = scalar_lea.hbm %s1107_s4, 16  ;;  %s767_s21 = int_to_ptr.hbm [resolvable:$true] %s766_s21 }
  0xbb   : > { %s768_s8 = scalar_lea.hbm %s767_s21, 8  ;;  %p773_p8 = scmp.lt.s32.totalorder %s767_s21, %s1107_s4 }
  0xbc   : > { %p769_p0 = scmp.ne.s32.totalorder %s767_s21, %s768_s8  ;;  %p774_p1 = scmp.lt.s32.totalorder %s772_s10, %s768_s8 }
  0xbe   : > { %p770_p2 = pnand %p769_p0, %p980_p4  ;;  %p775_p3 = por %p774_p1, %p773_p8 }
  0xc0   : > { %p771_p5 = pneg %p770_p2 }
  0xc2   : > { %p776_p9 = pnand %p775_p3, %p771_p5 }
 0x123   : > { %v335_v9 = vpop.permute.xlu0 %334 }
 0x124   : > { %337 = vst.msk [vmem:[%s290_s25] sm:$0xff] %vm307_vm0, %v335_v9 }
 0x125   : > { %779 = shalt.err (!%p776_p9)
}
 0x126   : > { %583 = dma.vmem_to_hbm [thread:$0]  (%p980_p4), %s382_s26, 128, %s384_s17, %s1052_s13  }
 0x127   : > { %s297_s28 = scalar_lea.vmem [#allocation10], %s1005_s27  ;;  %s398_s25 = sshll.u32 %s394_s7, 4  ;;  %s399_s25 = int_to_ptr.hbm [resolvable:$true] %s398_s25 }
 0x128   : > { %s396_s12 = sshll.u32 %s297_s28, 4  ;;  %s794_s0 = sshra.s32 %s399_s25, 4  ;;  %s397_s12 = int_to_ptr.vmem [resolvable:$true] %s396_s12  ;;  %s795_s0 = int_to_ptr.hbm [resolvable:$true] %s794_s0 }
 0x129   : > { %s796_s29 = scalar_lea.hbm %s795_s0, 8  ;;  %s800_s8 = scalar_lea.hbm %s1108_s5, 16 }
 0x12a   : > { %p797_p10 = scmp.ne.s32.totalorder %s795_s0, %s796_s29  ;;  %p801_p13 = scmp.lt.s32.totalorder %s795_s0, %s1108_s5 }
 0x12b   : > { %v339_v10 = vpop.permute.xlu0 %338  ;;  %p802_p0 = scmp.lt.s32.totalorder %s800_s8, %s796_s29 }
 0x12c   : > { %341 = vst.msk [vmem:[%s297_s28] sm:$0xff] %vm307_vm0, %v339_v10  ;;  %p798_p11 = pnand %p797_p10, %p980_p4 }
 0x12d   : > { %p803_p2 = por %p802_p0, %p801_p13 }
 0x12e   : > { %p799_p12 = pneg %p798_p11 }
 0x130   : > { %p804_p5 = pnand %p803_p2, %p799_p12 }
 0x132   : > { %807 = shalt.err (!%p804_p5)
}
 0x133   : > { %584 = dma.vmem_to_hbm [thread:$0]  (%p980_p4), %s397_s12, 128, %s399_s25, %s1052_s13  }
 0x134 PF: > { %s410_s17 = sand.u32 1, %s850_s18   ;;  %p597_p8 = pnand %p558_p6, %p988_p7 }
 0x135   : > { %s411_s7 = scalar_lea.sflag [#allocation4], %s410_s17 }
 0x136   : > { %p598_p1 = pneg %p597_p8 }
 0x138   : > { %841 = dma.done.wait (%p598_p1), %s411_s7, 128  }
 0x139   : > { %843 = vsyncadd (%p598_p1), %s411_s7, 4294967168  ;;  %s1117_s24 = sadd.s32 4294967294, %s870_s23  }
 0x13a   : > { %s420_s6 = sand.u32 1, %s1117_s24  }
 0x13b   : > { %s421_s10 = scalar_lea.sflag [#allocation9], %s420_s6 }
 0x13c   : > { %845 = dma.done.wait (%p598_p1), %s421_s10, 256  }
 0x13d   : > { %847 = vsyncadd (%p598_p1), %s421_s10, 4294967040  ;;  %s26_s23 = sadd.s32 1, %s870_s23   ;;  %s1118_s18 = smov %s854_s19 }
 0x13e   : > { %p23_p4 = scmp.ge.s32.totalorder %s26_s23, 4   ;;  %s1119_s19 = smov %s858_s20 }
 0x13f   : > { %s1120_s20 = smov %s986_s15  ;;  %s1121_s21 = smov %s866_s22 }
 0x140   : > { %s1122_s22 = smov %s1124_s9  ;;  %25 = sbr.rel (!%p23_p4) target bundleno = 11 (0xb), region = 113 }
 0x145   :  { %437 = vsyncpa [#allocation3], 1 }
 0x146   :  { %439 = vsyncpa [#allocation3 + $0x1], 1 }
 0x147   :  { %440 = vsyncpa [#allocation6], 1 }
 0x148   :  { %441 = vsyncpa [#allocation4], 1 }
 0x149   :  { %443 = vsyncpa [#allocation4 + $0x1], 1 }
 0x14a   :  { %444 = vsyncpa [#allocation9], 1 }
 0x14b   :  { %446 = vsyncpa [#allocation9 + $0x1], 1 }

</bundles_post_ra>
